<compile_context>
chip_gen: v7x
topology: tpu7x:2x2x1
jax: 0.10.0
libtpu: 0.0.40
codegen_flags: <defaults>
</compile_context>

<pallas_src>
import functools

import jax
import jax.numpy as jnp
from jax.experimental import pallas as pl
from jax.experimental.pallas import tpu as pltpu

LANE = 128
NEG_SLOPE = 0.01  # nn.LeakyReLU() default negative_slope


def mlp_kernel(x_ref, w1_ref, b1_ref, w2_ref, b2_ref, w3_ref, b3_ref, o_ref):
    # Single cast point: bf16 operands into the MXU (weights pre-cast in
    # prepare_params); accumulation + all elementwise math stays f32.
    x = x_ref[...].astype(jnp.bfloat16)

    # Layer 1: Linear + LeakyReLU   (Dropout -> identity at inference)
    h1 = jnp.dot(x, w1_ref[...], preferred_element_type=jnp.float32) + b1_ref[...]
    h1 = jnp.maximum(h1, NEG_SLOPE * h1)

    # Layer 2: Linear + LeakyReLU   (Dropout -> identity at inference)
    h2 = jnp.dot(h1.astype(jnp.bfloat16), w2_ref[...],
                 preferred_element_type=jnp.float32) + b2_ref[...]
    h2 = jnp.maximum(h2, NEG_SLOPE * h2)

    # Layer 3: Linear.  w3/b3 are padded to a full 128-lane block; the padded
    # columns carry a -1e30 f32 bias so exp() underflows to 0 and the softmax
    # over the padded block equals the softmax over the real columns.
    logits = jnp.dot(h2.astype(jnp.bfloat16), w3_ref[...],
                     preferred_element_type=jnp.float32) + b3_ref[...]

    # Numerically stable softmax over the last (lane) axis, in-vreg.
    m = jnp.max(logits, axis=-1, keepdims=True)
    e = jnp.exp(logits - m)
    denom = jnp.sum(e, axis=-1, keepdims=True)
    inv = pl.reciprocal(denom, approx=True)   # EUP slot, off the VPU

    # Store only the real output columns (lane padding never reaches HBM).
    out_size = o_ref.shape[-1]
    o_ref[...] = (e[:, :out_size] * inv).astype(o_ref.dtype)


def prepare_params(params):
    """One-time weight prep: bf16 weights for the MXU, 128-lane-padded w3/b3.

    Keep the result around across calls so per-call work is only pallas_call.
    """
    w1, b1 = params["w1"], params["b1"]
    w2, b2 = params["w2"], params["b2"]
    w3, b3 = params["w3"], params["b3"]

    h2_size, out_size = w3.shape
    out_pad = max(LANE, ((out_size + LANE - 1) // LANE) * LANE)

    w3p = jnp.zeros((h2_size, out_pad), jnp.float32).at[:, :out_size].set(w3)
    # Bias stays f32 (added to the f32 accumulator) -- the -1e30 padding trick
    # relies on logits being f32 before the exp.
    b3p = jnp.full((1, out_pad), -1e30, jnp.float32).at[:, :out_size].set(b3)

    return {
        "w1": w1.astype(jnp.bfloat16), "b1": b1,
        "w2": w2.astype(jnp.bfloat16), "b2": b2,
        "w3": w3p.astype(jnp.bfloat16), "b3": b3p,
        "out_size": out_size,
    }


def _pick_batch_tile(B, block_b):
    """Batch tile: multiple of 8 sublanes; even grid length for v7x megacore."""
    tb = min(block_b, B)
    if tb >= B:
        return B
    tb = max(8, (tb // 8) * 8)
    n = pl.cdiv(B, tb)
    if n > 1 and n % 2 == 1:
        # Prefer an even number of grid steps so the "parallel" batch axis
        # splits evenly across the 2 TensorCores on v7x.
        n += 1
        tb = max(8, ((pl.cdiv(B, n) + 7) // 8) * 8)
    return tb


@functools.partial(jax.jit, static_argnames=("out_size", "block_b"))
def mlp_forward(x, w1b, b1, w2b, b2, w3b, b3p, *, out_size, block_b=4096):
    """Fused MLP forward.  x: [B, input_size] -> [B, out_size] f32."""
    B, in_size = x.shape
    h1_size, h2_size = w1b.shape[1], w2b.shape[1]
    out_pad = w3b.shape[1]

    # Batch tile: only dim 0 of x / out streams through the grid (auto-
    # pipelined, double-buffered); weights/biases are one full VMEM block each
    # with a constant index_map (fetched once, kept resident).  At block_b=4096
    # the live VMEM (tiles + f32 intermediates) is ~8 MiB -- under every
    # generation's scoped default (v5e 16 MiB / v6e 32 MiB / v7x 32 MiB);
    # raise vmem_limit_bytes only if you push block_b past ~8192.
    tb = _pick_batch_tile(B, block_b)
    grid = (pl.cdiv(B, tb),)
    # Note: rows past B in a partial final block compute garbage softmax values
    # that Pallas masks on writeback -- benign as long as nothing reduces over
    # the batch axis inside the kernel.

    def resident(a):
        return pl.BlockSpec(a.shape, lambda i, _nd=a.ndim: (0,) * _nd)

    flops = 2 * B * (in_size * h1_size + h1_size * h2_size + h2_size * out_pad)
    bytes_accessed = (x.size * x.dtype.itemsize
                      + w1b.size * 2 + w2b.size * 2 + w3b.size * 2
                      + b1.size * 4 + b2.size * 4 + b3p.size * 4
                      + B * out_size * 4)

    return pl.pallas_call(
        mlp_kernel,
        out_shape=jax.ShapeDtypeStruct((B, out_size), jnp.float32),
        grid=grid,
        in_specs=[
            pl.BlockSpec((tb, in_size), lambda i: (i, 0)),   # x streams
            resident(w1b), resident(b1),
            resident(w2b), resident(b2),
            resident(w3b), resident(b3p),
        ],
        out_specs=pl.BlockSpec((tb, out_size), lambda i: (i, 0)),  # lane-tight
        compiler_params=pltpu.CompilerParams(
            dimension_semantics=("parallel",)),              # 2 TCs on v7x
        cost_estimate=pl.CostEstimate(
            flops=flops,
            transcendentals=B * out_pad,                     # exp (+ rcp)
            bytes_accessed=bytes_accessed),
    )(x, w1b, b1, w2b, b2, w3b, b3p)


def init_params(key, input_size, hidden_layers, output_size):
    """Deterministic init. Weights stored as [in, out] (transposed vs PyTorch)."""
    ks = jax.random.split(key, 6)

    def lin(kw, kb, fan_in, fan_out):
        bound = 1.0 / jnp.sqrt(fan_in)
        w = jax.random.uniform(kw, (fan_in, fan_out), jnp.float32, -bound, bound)
        b = jax.random.uniform(kb, (1, fan_out), jnp.float32, -bound, bound)
        return w, b

    w1, b1 = lin(ks[0], ks[1], input_size, hidden_layers[0])
    w2, b2 = lin(ks[2], ks[3], hidden_layers[0], hidden_layers[1])
    w3, b3 = lin(ks[4], ks[5], hidden_layers[1], output_size)
    return {"w1": w1, "b1": b1, "w2": w2, "b2": b2, "w3": w3, "b3": b3}


if __name__ == "__main__":
    key = jax.random.PRNGKey(0)
    k_x, k_p = jax.random.split(key)

    batch = 8
    input_size = 32
    hidden_layers = (64, 32)
    output_size = 16

    x = jax.random.normal(k_x, (batch, input_size), dtype=jnp.float32)
    params = init_params(k_p, input_size, hidden_layers, output_size)

    # One-time weight prep (bf16 cast + 128-lane padding), reused every call.
    prepped = prepare_params(params)

    out = jax.block_until_ready(
        mlp_forward(x,
                    prepped["w1"], prepped["b1"],
                    prepped["w2"], prepped["b2"],
                    prepped["w3"], prepped["b3"],
                    out_size=prepped["out_size"]))

    # Plain-JAX f32 reference of the same forward pass (eval mode: Dropout=id).
    # TODO(synk): training-mode Dropout(0.5) would need pltpu.prng_seed /
    # prng_random_bits masking + rescale inside the kernel; eval semantics only.
    def ref(x, p):
        h = jnp.dot(x, p["w1"]) + p["b1"]
        h = jnp.where(h >= 0, h, 0.01 * h)
        h = jnp.dot(h, p["w2"]) + p["b2"]
        h = jnp.where(h >= 0, h, 0.01 * h)
        return jax.nn.softmax(jnp.dot(h, p["w3"]) + p["b3"], axis=-1)

    expected = ref(x, params)
    assert out.shape == (batch, output_size)
    # bf16 MXU operands + approximate EUP reciprocal => compare against the
    # f32 reference with a correspondingly loose (but meaningful) tolerance.
    max_err = float(jnp.max(jnp.abs(out - expected)))
    assert max_err < 5e-2, f"max abs err {max_err}"
    assert jnp.allclose(jnp.sum(out, axis=-1), 1.0, atol=1e-2)

    print("KERNEL_OK")
</pallas_src>

<mosaic_0001>
module attributes {stable_mosaic.version = 11 : i64} {
  func.func @mlp_kernel(%arg0: i32, %arg1: memref<8x32xf32, #tpu.memory_space<vmem>>, %arg2: memref<32x64xbf16, #tpu.memory_space<vmem>>, %arg3: memref<1x64xf32, #tpu.memory_space<vmem>>, %arg4: memref<64x32xbf16, #tpu.memory_space<vmem>>, %arg5: memref<1x32xf32, #tpu.memory_space<vmem>>, %arg6: memref<32x128xbf16, #tpu.memory_space<vmem>>, %arg7: memref<1x128xf32, #tpu.memory_space<vmem>>, %arg8: memref<8x16xf32, #tpu.memory_space<vmem>>) attributes {dimension_semantics = [#tpu.dimension_semantics<parallel>], iteration_bounds = array<i64: 1>, scalar_prefetch = 0 : i64, scratch_operands = 0 : i64, tpu.core_type = #tpu.core_type<tc>, window_params = [{transform_indices = @transform_0, window_bounds = array<i64: 8, 32>}, {pipeline_mode = #tpu.pipeline_mode<synchronous>, transform_indices = @transform_1, window_bounds = array<i64: 32, 64>}, {pipeline_mode = #tpu.pipeline_mode<synchronous>, transform_indices = @transform_2, window_bounds = array<i64: 1, 64>}, {pipeline_mode = #tpu.pipeline_mode<synchronous>, transform_indices = @transform_3, window_bounds = array<i64: 64, 32>}, {pipeline_mode = #tpu.pipeline_mode<synchronous>, transform_indices = @transform_4, window_bounds = array<i64: 1, 32>}, {pipeline_mode = #tpu.pipeline_mode<synchronous>, transform_indices = @transform_5, window_bounds = array<i64: 32, 128>}, {pipeline_mode = #tpu.pipeline_mode<synchronous>, transform_indices = @transform_6, window_bounds = array<i64: 1, 128>}, {transform_indices = @transform_7, window_bounds = array<i64: 8, 16>}]} {
    %c0 = arith.constant 0 : index
    %c0_0 = arith.constant 0 : index
    %0 = vector.load %arg1[%c0, %c0_0] : memref<8x32xf32, #tpu.memory_space<vmem>>, vector<8x32xf32>
    %1 = arith.truncf %0 : vector<8x32xf32> to vector<8x32xbf16>
    %c0_1 = arith.constant 0 : index
    %c0_2 = arith.constant 0 : index
    %2 = vector.load %arg2[%c0_1, %c0_2] : memref<32x64xbf16, #tpu.memory_space<vmem>>, vector<32x64xbf16>
    %cst = arith.constant dense<0.000000e+00> : vector<8x64xf32>
    %3 = tpu.matmul %1, %2, %cst {dimension_numbers = #tpu.dot_dimension_numbers<[1], [0], [0], [1], [0, 0, 1, 1], [], []>} : vector<8x32xbf16>, vector<32x64xbf16>, vector<8x64xf32> -> vector<8x64xf32>
    %c0_3 = arith.constant 0 : index
    %c0_4 = arith.constant 0 : index
    %4 = vector.load %arg3[%c0_3, %c0_4] : memref<1x64xf32, #tpu.memory_space<vmem>>, vector<1x64xf32>
    %5 = vector.broadcast %4 : vector<1x64xf32> to vector<8x64xf32>
    %6 = arith.addf %3, %5 : vector<8x64xf32>
    %cst_5 = arith.constant 0.00999999977 : f32
    %7 = vector.broadcast %cst_5 : f32 to vector<8x64xf32>
    %8 = arith.mulf %7, %6 : vector<8x64xf32>
    %9 = arith.maximumf %6, %8 : vector<8x64xf32>
    %10 = arith.truncf %9 : vector<8x64xf32> to vector<8x64xbf16>
    %c0_6 = arith.constant 0 : index
    %c0_7 = arith.constant 0 : index
    %11 = vector.load %arg4[%c0_6, %c0_7] : memref<64x32xbf16, #tpu.memory_space<vmem>>, vector<64x32xbf16>
    %cst_8 = arith.constant dense<0.000000e+00> : vector<8x32xf32>
    %12 = tpu.matmul %10, %11, %cst_8 {dimension_numbers = #tpu.dot_dimension_numbers<[1], [0], [0], [1], [0, 0, 1, 1], [], []>} : vector<8x64xbf16>, vector<64x32xbf16>, vector<8x32xf32> -> vector<8x32xf32>
    %c0_9 = arith.constant 0 : index
    %c0_10 = arith.constant 0 : index
    %13 = vector.load %arg5[%c0_9, %c0_10] : memref<1x32xf32, #tpu.memory_space<vmem>>, vector<1x32xf32>
    %14 = vector.broadcast %13 : vector<1x32xf32> to vector<8x32xf32>
    %15 = arith.addf %12, %14 : vector<8x32xf32>
    %cst_11 = arith.constant 0.00999999977 : f32
    %16 = vector.broadcast %cst_11 : f32 to vector<8x32xf32>
    %17 = arith.mulf %16, %15 : vector<8x32xf32>
    %18 = arith.maximumf %15, %17 : vector<8x32xf32>
    %19 = arith.truncf %18 : vector<8x32xf32> to vector<8x32xbf16>
    %c0_12 = arith.constant 0 : index
    %c0_13 = arith.constant 0 : index
    %20 = vector.load %arg6[%c0_12, %c0_13] : memref<32x128xbf16, #tpu.memory_space<vmem>>, vector<32x128xbf16>
    %cst_14 = arith.constant dense<0.000000e+00> : vector<8x128xf32>
    %21 = tpu.matmul %19, %20, %cst_14 {dimension_numbers = #tpu.dot_dimension_numbers<[1], [0], [0], [1], [0, 0, 1, 1], [], []>} : vector<8x32xbf16>, vector<32x128xbf16>, vector<8x128xf32> -> vector<8x128xf32>
    %c0_15 = arith.constant 0 : index
    %c0_16 = arith.constant 0 : index
    %22 = vector.load %arg7[%c0_15, %c0_16] : memref<1x128xf32, #tpu.memory_space<vmem>>, vector<1x128xf32>
    %23 = vector.broadcast %22 : vector<1x128xf32> to vector<8x128xf32>
    %24 = arith.addf %21, %23 : vector<8x128xf32>
    %cst_17 = arith.constant dense<0xFF800000> : vector<8xf32>
    %25 = vector.multi_reduction <maximumf>, %24, %cst_17 [1] : vector<8x128xf32> to vector<8xf32>
    %26 = vector.shape_cast %25 : vector<8xf32> to vector<8x1xf32>
    %27 = vector.broadcast %26 : vector<8x1xf32> to vector<8x128xf32>
    %28 = arith.subf %24, %27 : vector<8x128xf32>
    %29 = math.exp %28 : vector<8x128xf32>
    %cst_18 = arith.constant dense<0.000000e+00> : vector<8xf32>
    %30 = vector.multi_reduction <add>, %29, %cst_18 [1] : vector<8x128xf32> to vector<8xf32>
    %31 = vector.shape_cast %30 : vector<8xf32> to vector<8x1xf32>
    %32 = tpu.reciprocal %31 {approx = true} : vector<8x1xf32> -> vector<8x1xf32>
    %33 = vector.extract_strided_slice %29 {offsets = [0, 0], sizes = [8, 16], strides = [1, 1]} : vector<8x128xf32> to vector<8x16xf32>
    %34 = vector.broadcast %32 : vector<8x1xf32> to vector<8x16xf32>
    %35 = arith.mulf %33, %34 : vector<8x16xf32>
    %c0_19 = arith.constant 0 : index
    %c0_20 = arith.constant 0 : index
    %36 = vector.load %arg8[%c0_19, %c0_20] : memref<8x16xf32, #tpu.memory_space<vmem>>, vector<8x16xf32>
    tpu.vector_store %arg8[%c0_19, %c0_20], %35 {strides = array<i32>} : memref<8x16xf32, #tpu.memory_space<vmem>>, vector<8x16xf32>,
    return
  }
  func.func @transform_0(%arg0: i32) -> (i32, i32) {
    %c0_i32 = arith.constant 0 : i32
    %c0_i32_0 = arith.constant 0 : i32
    return %arg0, %c0_i32 : i32, i32
  }
  func.func @transform_1(%arg0: i32) -> (i32, i32) {
    %c0_i32 = arith.constant 0 : i32
    %c0_i32_0 = arith.constant 0 : i32
    %c0_i32_1 = arith.constant 0 : i32
    return %c0_i32, %c0_i32_0 : i32, i32
  }
  func.func @transform_2(%arg0: i32) -> (i32, i32) {
    %c0_i32 = arith.constant 0 : i32
    %c0_i32_0 = arith.constant 0 : i32
    %c0_i32_1 = arith.constant 0 : i32
    return %c0_i32, %c0_i32_0 : i32, i32
  }
  func.func @transform_3(%arg0: i32) -> (i32, i32) {
    %c0_i32 = arith.constant 0 : i32
    %c0_i32_0 = arith.constant 0 : i32
    %c0_i32_1 = arith.constant 0 : i32
    return %c0_i32, %c0_i32_0 : i32, i32
  }
  func.func @transform_4(%arg0: i32) -> (i32, i32) {
    %c0_i32 = arith.constant 0 : i32
    %c0_i32_0 = arith.constant 0 : i32
    %c0_i32_1 = arith.constant 0 : i32
    return %c0_i32, %c0_i32_0 : i32, i32
  }
  func.func @transform_5(%arg0: i32) -> (i32, i32) {
    %c0_i32 = arith.constant 0 : i32
    %c0_i32_0 = arith.constant 0 : i32
    %c0_i32_1 = arith.constant 0 : i32
    return %c0_i32, %c0_i32_0 : i32, i32
  }
  func.func @transform_6(%arg0: i32) -> (i32, i32) {
    %c0_i32 = arith.constant 0 : i32
    %c0_i32_0 = arith.constant 0 : i32
    %c0_i32_1 = arith.constant 0 : i32
    return %c0_i32, %c0_i32_0 : i32, i32
  }
  func.func @transform_7(%arg0: i32) -> (i32, i32) {
    %c0_i32 = arith.constant 0 : i32
    %c0_i32_0 = arith.constant 0 : i32
    return %arg0, %c0_i32 : i32, i32
  }
}

</mosaic_0001>

<bundles_post_ra>
// kernel: mlp_forward.1
= control target key start
LH: loop header
LB: loop body
LE: loop exit
PB: predicated region body
PF: predicated region fallthrough
CT: control target
= control target key end

     0   :  { %v369_v1 = vmov 0.0   ;;  %vm370_vm0 = vmmov 0   ;;  %vm53_vm1 = vcmask 261120   ;;  %s465_s0 = inlined_call_operand.vmem [shape: f32[8,32], index: 0, kind: input, shape index: {}]   ;;  %s466_s1 = inlined_call_operand.vmem [shape: bf16[32,64], index: 1, kind: input, shape index: {}]   ;;  %s467_s2 = inlined_call_operand.vmem [shape: f32[1,64], index: 2, kind: input, shape index: {}]   ;;  %s468_s3 = inlined_call_operand.vmem [shape: bf16[64,32], index: 3, kind: input, shape index: {}]   ;;  %s469_s4 = inlined_call_operand.vmem [shape: f32[1,32], index: 4, kind: input, shape index: {}]   ;;  %s470_s5 = inlined_call_operand.vmem [shape: bf16[32,128], index: 5, kind: input, shape index: {}]   ;;  %s471_s6 = inlined_call_operand.vmem [shape: f32[1,128], index: 6, kind: input, shape index: {}]   ;;  %s472_s7 = inlined_call_operand.hbm [shape: f32[8,16], index: 7, kind: output, shape index: {}]  }
   0x1   :  { %v333_v0 = vld [vmem:[%s466_s1] sm:$0xff]   ;;  %302 = vmatprep.subr.bf16.mxu0 %v369_v1  ;;  %v334_v2 = vld [vmem:[%s466_s1 + $0x8] sm:$0xff]   ;;  %310 = vmatprep.subr.bf16.mxu1 %v369_v1 }
   0x2   :  { %303 = vmatpush3.bf16.msra.mxu0 %v333_v0  ;;  %306 = vmatprep.mubr.msk.bf16.mxu0 %vm370_vm0, %v369_v1  ;;  %v28_v3 = vld [vmem:[%s465_s0] sm:$0xff]  ;;  %v336_v5 = vld [vmem:[%s468_s3 + $0x8] sm:$0xff]  }
   0x3   :  { %304 = vmatprep.subr.bf16.mxu0 %v369_v1  ;;  %v335_v4 = vld [vmem:[%s468_s3] sm:$0xff]   ;;  %318 = vmatprep.mubr.msk.bf16.mxu1 %vm370_vm0, %v369_v1  ;;  %v29_v6 = vpack.c.bf16 %v28_v3, %v28_v3 }
   0x4   :  { %311 = vmatpush3.bf16.msra.mxu1 %v335_v4 }
   0x5   :  { %312 = vmatprep.subr.bf16.mxu1 %v369_v1 }
   0x6   :  { %305 = vmatpush3.bf16.msra.mxu0 %v334_v2 }
   0x7   :  { %322 = vmatprep.subr.bf16.mxu0 %v369_v1 }
   0x8   :  { %12 = vsyncpa [#allocation3], 0  ;;  %313 = vmatpush3.bf16.msra.mxu1 %v336_v5  ;;  %v337_v7 = vld [vmem:[%s468_s3 + $0x10] sm:$0xff]   ;;  %v338_v8 = vld [vmem:[%s468_s3 + $0x18] sm:$0xff]   ;;  %vm139_vm2 = vcmask 523264   ;;  %vm261_vm3 = vcmask 130048  }
   0x9   :  { %307 = vmatmul.mubr.msk.bf16.vlgmr.msra.gmra.mrb[0].mxu0 %vm53_vm1, %v29_v6  ;;  %314 = vmatprep.subr.bf16.mxu1 %v369_v1  ;;  %v277_v9 = vld [vmem:[%s467_s2] ss:$0 sm:$0xff]  ;;  %v340_v19 = vld [vmem:[%s470_s5 + $0x8] sm:$0xff]  }
   0xa   :  { %326 = vmatprep.mubr.msk.bf16.mxu0 %vm370_vm0, %v369_v1  ;;  %v339_v18 = vld [vmem:[%s470_s5] sm:$0xff]  }
   0xb   :  { %323 = vmatpush3.bf16.msra.mxu0 %v339_v18  ;;  %v281_v20 = vld [vmem:[%s469_s4] ss:$0 sm:$0xff]  ;;  %s371_s4 = smov [#allocation2]  }
   0xc   :  { %315 = vmatpush3.bf16.msra.mxu1 %v337_v7  ;;  %324 = vmatprep.subr.bf16.mxu0 %v369_v1  ;;  %v287_v29 = vld [vmem:[%s471_s6] ss:$0 sm:$0xff]  ;;  %s269_s5 = sshll.u32 %s371_s4, 4  ;;  %s270_s5 = int_to_ptr.vmem [resolvable:$true] %s269_s5 }
   0xd   :  { %316 = vmatprep.subr.bf16.mxu1 %v369_v1  ;;  %s345_s6 = scalar_lea.vmem %s270_s5, 128  ;;  %p350_p1 = scmp.lt.s32.totalorder %s270_s5, %s270_s5 }
   0xe   :  { %p346_p0 = scmp.ne.s32.totalorder %s270_s5, %s345_s6  ;;  %p351_p2 = scmp.lt.s32.totalorder %s345_s6, %s345_s6 }
   0xf   :  { %325 = vmatpush3.bf16.msra.mxu0 %v340_v19 }
  0x10   :  { %317 = vmatpush3.bf16.msra.mxu1 %v338_v8  ;;  %p352_p3 = por %p351_p2, %p350_p1 }
  0x12   :  { %p353_p4 = pnand %p352_p3, %p346_p0 }
  0xdc   :  { %v91_v10 = vpop.f32.mrb[0].mxu0 }
  0xdd   :  { %v92_v11 = vadd.f32 %v277_v9, %v91_v10  ;;  %v308_v12 = vpop.f32.mrb[1].mxu0 }
  0xde   :  { %v94_v13 = vpop.f32.mrb[2].mxu0 }
  0xdf   :  { %v97_v14 = vmul.f32 0.01, %v92_v11  ;;  %v309_v15 = vpop.f32.mrb[3].mxu0 }
  0xe1   :  { %v98_v16 = vmax.f32 %v92_v11, %v97_v14 }
  0xe3   :  { %v99_v17 = vpack.c.bf16 %v98_v16, %v98_v16 }
  0xe5   :  { %319 = vmatmul.mubr.msk.bf16.vlgmr.msra.gmra.mrb[0].mxu1 %vm139_vm2, %v99_v17 }
 0x1b8   :  { %v177_v21 = vpop.f32.mrb[0].mxu1 }
 0x1b9   :  { %v178_v22 = vadd.f32 %v281_v20, %v177_v21  ;;  %v320_v23 = vpop.f32.mrb[1].mxu1 }
 0x1ba   :  { %v180_v24 = vpop.f32.mrb[2].mxu1 }
 0x1bb   :  { %v183_v25 = vmul.f32 0.01, %v178_v22  ;;  %v321_v26 = vpop.f32.mrb[3].mxu1 }
 0x1bd   :  { %v184_v27 = vmax.f32 %v178_v22, %v183_v25 }
 0x1bf   :  { %v185_v28 = vpack.c.bf16 %v184_v27, %v184_v27 }
 0x1c1   :  { %327 = vmatmul.mubr.msk.bf16.vlgmr.msra.gmra.mrb[4].mxu0 %vm53_vm1, %v185_v28 }
 0x294   :  { %v246_v30 = vpop.f32.mrb[4].mxu0 }
 0x295   :  { %v247_v31 = vadd.f32 %v287_v29, %v246_v30  ;;  %v328_v32 = vpop.f32.mrb[5].mxu0 }
 0x296   :  { %v249_v33 = vpop.f32.mrb[6].mxu0 }
 0x297   :  { %252 = vmax.xlane.f32.xlu0 %v247_v31  ;;  %v329_v34 = vpop.f32.mrb[7].mxu0 }
 0x324   :  { %v253_v35 = vpop.xlane.xlu0 %252 }
 0x325   :  { %v254_v36 = vsub.f32 %v247_v31, %v253_v35 }
 0x327   :  { %v255_v37 = vmul.f32 1.442695, %v254_v36 }
 0x329   :  { %341 = vpow2.f32 %v255_v37 }
 0x333   :  { %v342_v38 = vpop.eup %341 }
 0x334   :  { %257 = vadd.xlane.f32.xlu0 %v342_v38 }
 0x3c1   :  { %v258_v39 = vpop.xlane.xlu0 %257 }
 0x3c2   :  { %343 = vrcp.f32 %v258_v39 }
 0x3cc   :  { %v344_v40 = vpop.eup %343 }
 0x3cd   :  { %v260_v41 = vmul.f32 %v344_v40, %v342_v38 }
 0x3cf   :  { %262 = vst.msk [vmem:[#allocation2] sm:$0xff] %vm261_vm3, %v260_v41 }
 0x3d0   :  { %356 = shalt.err (!%p353_p4)
}
 0x3d1   :  { %s357_s23 = scalar_lea.hbm %s472_s7, 128 }
 0x3d2   :  { %p358_p5 = scmp.ne.s32.totalorder %s472_s7, %s357_s23  ;;  %p361_p6 = scmp.lt.u32.totalorder %s357_s23, %s472_s7 }
 0x3d4   :  { %p363_p7 = pnand %p361_p6, %p358_p5 }
 0x3d6   :  { %366 = shalt.err (!%p363_p7)
}
 0x3d7   :  { %272 = dma.vmem_to_hbm [thread:$0]  %s270_s5, 128, %s472_s7, [#allocation3]  }
 0x3d8   :  { %367 = dma.done.wait [#allocation3], 128  }
 0x3d9   :  { %368 = vsyncadd [#allocation3], 4294967168 }
 0x3da   :  { %276 = vsyncpa [#allocation3], 1 }

</bundles_post_ra>
